<compile_context>
chip_gen: v7x
topology: tpu7x:2x2x1
jax: 0.10.0
libtpu: 0.0.40
codegen_flags: <defaults>
</compile_context>

<pallas_src>
import math
import functools

import jax
import jax.numpy as jnp
from jax import lax
from jax.experimental import pallas as pl
from jax.experimental.pallas import tpu as pltpu


def _seq_tile(s, target=256):
    """Largest sequence tile <= target that divides s (multiple of 8 when tiled)."""
    if s <= target:
        return s
    for t in range(target, 7, -8):
        if s % t == 0:
            return t
    return s


# ----------------------------------------------------------------------------
# Kernel 1: fused QKV projection + RoPE (roll-free, per-head slice/negate/concat)
# ----------------------------------------------------------------------------
def _qkv_rope_kernel(x_ref, w_ref, b_ref, cos_ref, sin_ref,
                     q_ref, k_ref, v_ref, *, hq, hkv, hd):
    # x: (1, ts, d)   w: (d, n_tot)   b: (1, n_tot)   cos/sin: (ts, hd)
    x = x_ref[0].astype(w_ref.dtype)                                   # (ts, d)
    qkv = jnp.dot(x, w_ref[...], preferred_element_type=jnp.float32)   # (ts, n_tot) f32
    qkv = qkv + b_ref[...]

    cos = cos_ref[...]                                                 # (ts, hd)
    sin = sin_ref[...]
    half = hd // 2
    n_q, n_kv = hq * hd, hkv * hd

    def rope(block, nheads):
        # Per-head rotate_half via static slice + negate + concat; cos/sin broadcast
        # from the single (ts, hd) table.  No MXU work, hides under the projection.
        outs = []
        for h in range(nheads):
            xh = block[:, h * hd:(h + 1) * hd]                         # (ts, hd)
            rot = jnp.concatenate([-xh[:, half:], xh[:, :half]], axis=1)
            outs.append(xh * cos + rot * sin)
        return outs[0] if nheads == 1 else jnp.concatenate(outs, axis=1)

    q_ref[0] = rope(qkv[:, :n_q], hq).astype(q_ref.dtype)
    k_ref[0] = rope(qkv[:, n_q:n_q + n_kv], hkv).astype(k_ref.dtype)
    v_ref[0] = qkv[:, n_q + n_kv:].astype(v_ref.dtype)


def fused_qkv_rope(x, w_qkv, b_qkv, cos, sin, *, hq, hkv, hd, out_dtype):
    b, s, d = x.shape
    n_tot = w_qkv.shape[1]
    n_q, n_kv = hq * hd, hkv * hd
    ts = _seq_tile(s)
    grid = (b, s // ts)
    kernel = functools.partial(_qkv_rope_kernel, hq=hq, hkv=hkv, hd=hd)
    return pl.pallas_call(
        kernel,
        out_shape=(jax.ShapeDtypeStruct((b, s, n_q), out_dtype),
                   jax.ShapeDtypeStruct((b, s, n_kv), out_dtype),
                   jax.ShapeDtypeStruct((b, s, n_kv), out_dtype)),
        grid=grid,
        in_specs=[
            pl.BlockSpec((1, ts, d), lambda i, t: (i, t, 0)),
            pl.BlockSpec((d, n_tot), lambda i, t: (0, 0)),
            pl.BlockSpec((1, n_tot), lambda i, t: (0, 0)),
            pl.BlockSpec((ts, hd), lambda i, t: (t, 0)),
            pl.BlockSpec((ts, hd), lambda i, t: (t, 0)),
        ],
        out_specs=(
            pl.BlockSpec((1, ts, n_q), lambda i, t: (i, t, 0)),
            pl.BlockSpec((1, ts, n_kv), lambda i, t: (i, t, 0)),
            pl.BlockSpec((1, ts, n_kv), lambda i, t: (i, t, 0)),
        ),
        compiler_params=pltpu.CompilerParams(
            dimension_semantics=("parallel", "parallel")),
    )(x, w_qkv, b_qkv.reshape(1, n_tot).astype(jnp.float32), cos, sin)


# ----------------------------------------------------------------------------
# Kernel 2: fused attention (GQA, softmax) + output projection, lane-dense I/O
# ----------------------------------------------------------------------------
def _attn_out_kernel(q_ref, k_ref, v_ref, m_ref, wo_ref, bo_ref, o_ref,
                     *, hq, hkv, hd, approx_recip):
    # q: (1, tq, hq*hd)  k/v: (1, skv, hkv*hd)  m: (1, 1, skv)  wo: (hq*hd, d)  bo: (1, d)
    group = hq // hkv
    q = q_ref[0]
    k = k_ref[0]
    v = v_ref[0]
    mask = m_ref[0]                                                    # (1, skv), additive
    tq = q.shape[0]

    ctx_heads = [None] * hq
    for g in range(hkv):
        kg = k[:, g * hd:(g + 1) * hd]                                 # (skv, hd)
        vg = v[:, g * hd:(g + 1) * hd]
        # GQA: fold the query group into the row dim -> (group*tq, hd); K/V never copied.
        qg = jnp.concatenate(
            [q[:, (g * group + j) * hd:(g * group + j + 1) * hd] for j in range(group)],
            axis=0)
        s = lax.dot_general(qg, kg, (((1,), (1,)), ((), ())),
                            preferred_element_type=jnp.float32)        # (group*tq, skv)
        s = s + mask                                                   # padding mask
        s = s - jnp.max(s, axis=-1, keepdims=True)
        p = jnp.exp(s)
        denom = jnp.sum(p, axis=-1, keepdims=True)
        ctx = jnp.dot(p.astype(vg.dtype), vg,
                      preferred_element_type=jnp.float32)              # (group*tq, hd)
        # Normalize ctx (hd wide) instead of p (skv wide).  Exact by default; flip
        # approx_recip=True in production to use the EUP reciprocal slot.
        inv = pl.reciprocal(denom, approx=True) if approx_recip else 1.0 / denom
        ctx = ctx * inv
        for j in range(group):
            ctx_heads[g * group + j] = ctx[j * tq:(j + 1) * tq, :]

    # Head reduction fused into one MXU contraction: (tq, hq*hd) @ (hq*hd, d).
    ctx_full = jnp.concatenate(ctx_heads, axis=1)
    out = jnp.dot(ctx_full.astype(wo_ref.dtype), wo_ref[...],
                  preferred_element_type=jnp.float32) + bo_ref[...]
    o_ref[0] = out.astype(o_ref.dtype)


def fused_attention_output(q_slab, k_slab, v_slab, mask_add, wo, bo, *,
                           hq, hkv, hd, out_dtype, approx_recip=False):
    b, s, n_q = q_slab.shape
    skv = k_slab.shape[1]
    n_kv = hkv * hd
    d = wo.shape[1]
    tq = _seq_tile(s)
    grid = (b, s // tq)
    kernel = functools.partial(_attn_out_kernel, hq=hq, hkv=hkv, hd=hd,
                               approx_recip=approx_recip)
    return pl.pallas_call(
        kernel,
        out_shape=jax.ShapeDtypeStruct((b, s, d), out_dtype),
        grid=grid,
        in_specs=[
            pl.BlockSpec((1, tq, n_q), lambda i, t: (i, t, 0)),
            pl.BlockSpec((1, skv, n_kv), lambda i, t: (i, 0, 0)),
            pl.BlockSpec((1, skv, n_kv), lambda i, t: (i, 0, 0)),
            pl.BlockSpec((1, 1, skv), lambda i, t: (i, 0, 0)),
            pl.BlockSpec((n_q, d), lambda i, t: (0, 0)),
            pl.BlockSpec((1, d), lambda i, t: (0, 0)),
        ],
        out_specs=pl.BlockSpec((1, tq, d), lambda i, t: (i, t, 0)),
        compiler_params=pltpu.CompilerParams(
            dimension_semantics=("parallel", "parallel")),
    )(q_slab, k_slab, v_slab, mask_add, wo, bo.reshape(1, d).astype(jnp.float32))


# ----------------------------------------------------------------------------
# Glue (plain JAX): params, fused weights, RoPE tables, padding mask
# ----------------------------------------------------------------------------
def build_padding_mask(attention_mask):
    # (b, s_kv) with 1 = token, 0 = padding  ->  additive (b, 1, s_kv)
    return (1.0 - attention_mask.astype(jnp.float32))[:, None, :] * -1e9


def make_rope(seq_len, head_dim, base=10000.0, dtype=jnp.float32):
    inv_freq = 1.0 / (base ** (jnp.arange(0, head_dim, 2, dtype=jnp.float32) / head_dim))
    t = jnp.arange(seq_len, dtype=jnp.float32)
    freqs = jnp.outer(t, inv_freq)
    emb = jnp.concatenate([freqs, freqs], axis=-1)
    return jnp.cos(emb).astype(dtype), jnp.sin(emb).astype(dtype)


def init_params(key, hidden_size, head_num_q, head_num_kv):
    head_dim = hidden_size // head_num_q
    ks = jax.random.split(key, 8)
    scale = 1.0 / math.sqrt(hidden_size)
    return {
        "head_num_q": head_num_q,
        "head_num_kv": head_num_kv,
        "head_dim": head_dim,
        "wq": jax.random.normal(ks[0], (hidden_size, head_num_q * head_dim), jnp.float32) * scale,
        "bq": jax.random.normal(ks[1], (head_num_q * head_dim,), jnp.float32) * 0.01,
        "wk": jax.random.normal(ks[2], (hidden_size, head_num_kv * head_dim), jnp.float32) * scale,
        "bk": jax.random.normal(ks[3], (head_num_kv * head_dim,), jnp.float32) * 0.01,
        "wv": jax.random.normal(ks[4], (hidden_size, head_num_kv * head_dim), jnp.float32) * scale,
        "bv": jax.random.normal(ks[5], (head_num_kv * head_dim,), jnp.float32) * 0.01,
        "wo": jax.random.normal(ks[6], (head_num_q * head_dim, hidden_size), jnp.float32) * scale,
        "bo": jax.random.normal(ks[7], (hidden_size,), jnp.float32) * 0.01,
    }


def fuse_params(params):
    """One-time weight fusion (done at init, not per forward).

    Folds the 1/sqrt(hd) attention scale into the Q columns — valid because RoPE
    is linear (elementwise cos/sin + rotate_half).
    """
    hq, hkv, hd = params["head_num_q"], params["head_num_kv"], params["head_dim"]
    scale = 1.0 / math.sqrt(hd)
    w_qkv = jnp.concatenate([params["wq"] * scale, params["wk"], params["wv"]], axis=1)
    b_qkv = jnp.concatenate([params["bq"] * scale, params["bk"], params["bv"]], axis=0)
    return {"hq": hq, "hkv": hkv, "hd": hd,
            "w_qkv": w_qkv, "b_qkv": b_qkv,
            "wo": params["wo"], "bo": params["bo"]}


def attention_forward(fused, x, attention_mask, position_embeddings=None,
                      past_kv=None, use_cache=False,
                      compute_dtype=jnp.float32, approx_softmax_recip=False):
    b, s, d = x.shape
    hq, hkv, hd = fused["hq"], fused["hkv"], fused["hd"]
    n_kv = hkv * hd

    if position_embeddings is None:
        cos = jnp.ones((s, hd), jnp.float32)
        sin = jnp.zeros((s, hd), jnp.float32)
    else:
        cos, sin = position_embeddings                 # each (s, hd)
        cos = cos.astype(jnp.float32)
        sin = sin.astype(jnp.float32)

    # Kernel 1: lane-dense q/k/v slabs straight out of the pallas_call — no HBM
    # reshape/transpose pass between the two kernels.
    q_slab, k_slab, v_slab = fused_qkv_rope(
        x, fused["w_qkv"].astype(compute_dtype), fused["b_qkv"], cos, sin,
        hq=hq, hkv=hkv, hd=hd, out_dtype=compute_dtype)

    if past_kv is not None:
        past_k, past_v = past_kv                       # (b, hkv, ps, hd)
        ps = past_k.shape[2]
        k_slab = jnp.concatenate(
            [past_k.transpose(0, 2, 1, 3).reshape(b, ps, n_kv).astype(k_slab.dtype),
             k_slab], axis=1)
        v_slab = jnp.concatenate(
            [past_v.transpose(0, 2, 1, 3).reshape(b, ps, n_kv).astype(v_slab.dtype),
             v_slab], axis=1)
    skv = k_slab.shape[1]

    # KV cache in the module's (b, hkv, skv, hd) layout (only for the cache output;
    # the attention kernel consumes the lane-dense slabs directly).
    present_kv = (k_slab.reshape(b, skv, hkv, hd).transpose(0, 2, 1, 3),
                  v_slab.reshape(b, skv, hkv, hd).transpose(0, 2, 1, 3))

    assert attention_mask.shape[-1] == skv, \
        "attention_mask must cover the full (past + new) kv length"
    mask_add = build_padding_mask(attention_mask)      # (b, 1, skv)

    out = fused_attention_output(
        q_slab, k_slab, v_slab, mask_add,
        fused["wo"].astype(compute_dtype), fused["bo"],
        hq=hq, hkv=hkv, hd=hd, out_dtype=x.dtype,
        approx_recip=approx_softmax_recip)
    # attn_dropout / out_dropout are no-ops in inference mode.
    return out, present_kv


# ----------------------------------------------------------------------------
# Pure-JAX reference (mirrors the PyTorch module op-for-op)
# ----------------------------------------------------------------------------
def _rotate_half(x):
    h = x.shape[-1] // 2
    return jnp.concatenate([-x[..., h:], x[..., :h]], axis=-1)


def reference_forward(params, x, attention_mask, position_embeddings):
    b, s, d = x.shape
    hq, hkv, hd = params["head_num_q"], params["head_num_kv"], params["head_dim"]
    x2d = x.reshape(b * s, d)
    q = (x2d @ params["wq"] + params["bq"]).reshape(b, s, hq, hd).transpose(0, 2, 1, 3)
    k = (x2d @ params["wk"] + params["bk"]).reshape(b, s, hkv, hd).transpose(0, 2, 1, 3)
    v = (x2d @ params["wv"] + params["bv"]).reshape(b, s, hkv, hd).transpose(0, 2, 1, 3)
    cos, sin = position_embeddings
    cos = cos[None, None]
    sin = sin[None, None]
    q = q * cos + _rotate_half(q) * sin
    k = k * cos + _rotate_half(k) * sin
    k_rep = jnp.repeat(k, hq // hkv, axis=1)
    v_rep = jnp.repeat(v, hq // hkv, axis=1)
    scores = jnp.einsum("bhqd,bhkd->bhqk", q, k_rep) / math.sqrt(hd)
    scores = scores + build_padding_mask(attention_mask)[:, None, :, :]
    probs = jax.nn.softmax(scores, axis=-1)
    out = jnp.einsum("bhqk,bhkd->bhqd", probs, v_rep)
    out = out.transpose(0, 2, 1, 3).reshape(b * s, hq * hd) @ params["wo"] + params["bo"]
    return out.reshape(b, s, d)


# ----------------------------------------------------------------------------
if __name__ == "__main__":
    hidden_size = 32
    num_attention_heads = 4
    num_key_value_heads = 2
    batch, seq = 2, 8

    key = jax.random.PRNGKey(0)
    k_param, k_x = jax.random.split(key)
    params = init_params(k_param, hidden_size, num_attention_heads, num_key_value_heads)
    fused = fuse_params(params)

    x = jax.random.normal(k_x, (batch, seq, hidden_size), jnp.float32)
    # second batch element has 2 padded positions at the end
    attention_mask = jnp.array([[1] * seq, [1] * (seq - 2) + [0] * 2], dtype=jnp.int32)
    position_embeddings = make_rope(seq, hidden_size // num_attention_heads)

    # f32 path (exact softmax reciprocal) — primary correctness check.
    out, (present_k, present_v) = attention_forward(
        fused, x, attention_mask,
        position_embeddings=position_embeddings,
        past_kv=None, use_cache=True,
        compute_dtype=jnp.float32)
    jax.block_until_ready(out)

    ref = reference_forward(params, x, attention_mask, position_embeddings)
    assert out.shape == (batch, seq, hidden_size)
    assert present_k.shape == (batch, num_key_value_heads, seq,
                               hidden_size // num_attention_heads)
    assert present_v.shape == present_k.shape
    # Agreement is ~1e-6 when f32 matmuls are exact; the margin covers TPU
    # default-precision (bf16-pass) f32 matmuls whose rounding differs between the
    # fused-kernel path and the layer-by-layer reference.
    assert jnp.allclose(out, ref, atol=3e-2, rtol=3e-2), "mismatch vs pure-JAX reference"

    # bf16 MXU-operand path (perf-review suggestion) — smoke test, loose tolerance.
    out_bf16, _ = attention_forward(
        fused, x, attention_mask,
        position_embeddings=position_embeddings,
        past_kv=None, use_cache=True,
        compute_dtype=jnp.bfloat16)
    jax.block_until_ready(out_bf16)
    assert out_bf16.shape == (batch, seq, hidden_size)
    assert jnp.allclose(out_bf16, ref, atol=1e-1, rtol=1e-1), "bf16 path diverged"

    print("KERNEL_OK")
</pallas_src>

<mosaic_0001>
module attributes {stable_mosaic.version = 11 : i64} {
  func.func @_qkv_rope_kernel(%arg0: i32, %arg1: i32, %arg2: memref<1x8x32xf32, #tpu.memory_space<vmem>>, %arg3: memref<32x64xf32, #tpu.memory_space<vmem>>, %arg4: memref<1x64xf32, #tpu.memory_space<vmem>>, %arg5: memref<8x8xf32, #tpu.memory_space<vmem>>, %arg6: memref<8x8xf32, #tpu.memory_space<vmem>>, %arg7: memref<1x8x32xf32, #tpu.memory_space<vmem>>, %arg8: memref<1x8x16xf32, #tpu.memory_space<vmem>>, %arg9: memref<1x8x16xf32, #tpu.memory_space<vmem>>) attributes {dimension_semantics = [#tpu.dimension_semantics<parallel>, #tpu.dimension_semantics<parallel>], iteration_bounds = array<i64: 2, 1>, scalar_prefetch = 0 : i64, scratch_operands = 0 : i64, tpu.core_type = #tpu.core_type<tc>, window_params = [{transform_indices = @transform_0, window_bounds = array<i64: 1, 8, 32>}, {pipeline_mode = #tpu.pipeline_mode<synchronous>, transform_indices = @transform_1, window_bounds = array<i64: 32, 64>}, {pipeline_mode = #tpu.pipeline_mode<synchronous>, transform_indices = @transform_2, window_bounds = array<i64: 1, 64>}, {transform_indices = @transform_3, window_bounds = array<i64: 8, 8>}, {transform_indices = @transform_4, window_bounds = array<i64: 8, 8>}, {transform_indices = @transform_5, window_bounds = array<i64: 1, 8, 32>}, {transform_indices = @transform_6, window_bounds = array<i64: 1, 8, 16>}, {transform_indices = @transform_7, window_bounds = array<i64: 1, 8, 16>}]} {
    %c0 = arith.constant 0 : index
    %c0_0 = arith.constant 0 : index
    %c0_1 = arith.constant 0 : index
    %0 = vector.load %arg2[%c0, %c0_0, %c0_1] : memref<1x8x32xf32, #tpu.memory_space<vmem>>, vector<1x8x32xf32>
    %1 = vector.shape_cast %0 : vector<1x8x32xf32> to vector<8x32xf32>
    %c0_2 = arith.constant 0 : index
    %c0_3 = arith.constant 0 : index
    %2 = vector.load %arg3[%c0_2, %c0_3] : memref<32x64xf32, #tpu.memory_space<vmem>>, vector<32x64xf32>
    %cst = arith.constant dense<0.000000e+00> : vector<8x64xf32>
    %3 = tpu.matmul %1, %2, %cst {dimension_numbers = #tpu.dot_dimension_numbers<[1], [0], [0], [1], [0, 0, 1, 1], [], []>} : vector<8x32xf32>, vector<32x64xf32>, vector<8x64xf32> -> vector<8x64xf32>
    %c0_4 = arith.constant 0 : index
    %c0_5 = arith.constant 0 : index
    %4 = vector.load %arg4[%c0_4, %c0_5] : memref<1x64xf32, #tpu.memory_space<vmem>>, vector<1x64xf32>
    %5 = vector.broadcast %4 : vector<1x64xf32> to vector<8x64xf32>
    %6 = arith.addf %3, %5 : vector<8x64xf32>
    %c0_6 = arith.constant 0 : index
    %c0_7 = arith.constant 0 : index
    %7 = vector.load %arg5[%c0_6, %c0_7] : memref<8x8xf32, #tpu.memory_space<vmem>>, vector<8x8xf32>
    %c0_8 = arith.constant 0 : index
    %c0_9 = arith.constant 0 : index
    %8 = vector.load %arg6[%c0_8, %c0_9] : memref<8x8xf32, #tpu.memory_space<vmem>>, vector<8x8xf32>
    %9 = vector.extract_strided_slice %6 {offsets = [0, 0], sizes = [8, 32], strides = [1, 1]} : vector<8x64xf32> to vector<8x32xf32>
    %10 = vector.extract_strided_slice %9 {offsets = [0, 0], sizes = [8, 8], strides = [1, 1]} : vector<8x32xf32> to vector<8x8xf32>
    %11 = vector.extract_strided_slice %10 {offsets = [0, 4], sizes = [8, 4], strides = [1, 1]} : vector<8x8xf32> to vector<8x4xf32>
    %cst_10 = arith.constant 0.000000e+00 : f32
    %12 = vector.broadcast %cst_10 : f32 to vector<8x4xf32>
    %13 = arith.subf %12, %11 : vector<8x4xf32>
    %14 = vector.extract_strided_slice %10 {offsets = [0, 0], sizes = [8, 4], strides = [1, 1]} : vector<8x8xf32> to vector<8x4xf32>
    %15 = tpu.concatenate %13, %14 in 1 : vector<8x4xf32>, vector<8x4xf32> -> vector<8x8xf32>
    %16 = arith.mulf %10, %7 : vector<8x8xf32>
    %17 = arith.mulf %15, %8 : vector<8x8xf32>
    %18 = arith.addf %16, %17 : vector<8x8xf32>
    %19 = vector.extract_strided_slice %9 {offsets = [0, 8], sizes = [8, 8], strides = [1, 1]} : vector<8x32xf32> to vector<8x8xf32>
    %20 = vector.extract_strided_slice %19 {offsets = [0, 4], sizes = [8, 4], strides = [1, 1]} : vector<8x8xf32> to vector<8x4xf32>
    %cst_11 = arith.constant 0.000000e+00 : f32
    %21 = vector.broadcast %cst_11 : f32 to vector<8x4xf32>
    %22 = arith.subf %21, %20 : vector<8x4xf32>
    %23 = vector.extract_strided_slice %19 {offsets = [0, 0], sizes = [8, 4], strides = [1, 1]} : vector<8x8xf32> to vector<8x4xf32>
    %24 = tpu.concatenate %22, %23 in 1 : vector<8x4xf32>, vector<8x4xf32> -> vector<8x8xf32>
    %25 = arith.mulf %19, %7 : vector<8x8xf32>
    %26 = arith.mulf %24, %8 : vector<8x8xf32>
    %27 = arith.addf %25, %26 : vector<8x8xf32>
    %28 = vector.extract_strided_slice %9 {offsets = [0, 16], sizes = [8, 8], strides = [1, 1]} : vector<8x32xf32> to vector<8x8xf32>
    %29 = vector.extract_strided_slice %28 {offsets = [0, 4], sizes = [8, 4], strides = [1, 1]} : vector<8x8xf32> to vector<8x4xf32>
    %cst_12 = arith.constant 0.000000e+00 : f32
    %30 = vector.broadcast %cst_12 : f32 to vector<8x4xf32>
    %31 = arith.subf %30, %29 : vector<8x4xf32>
    %32 = vector.extract_strided_slice %28 {offsets = [0, 0], sizes = [8, 4], strides = [1, 1]} : vector<8x8xf32> to vector<8x4xf32>
    %33 = tpu.concatenate %31, %32 in 1 : vector<8x4xf32>, vector<8x4xf32> -> vector<8x8xf32>
    %34 = arith.mulf %28, %7 : vector<8x8xf32>
    %35 = arith.mulf %33, %8 : vector<8x8xf32>
    %36 = arith.addf %34, %35 : vector<8x8xf32>
    %37 = vector.extract_strided_slice %9 {offsets = [0, 24], sizes = [8, 8], strides = [1, 1]} : vector<8x32xf32> to vector<8x8xf32>
    %38 = vector.extract_strided_slice %37 {offsets = [0, 4], sizes = [8, 4], strides = [1, 1]} : vector<8x8xf32> to vector<8x4xf32>
    %cst_13 = arith.constant 0.000000e+00 : f32
    %39 = vector.broadcast %cst_13 : f32 to vector<8x4xf32>
    %40 = arith.subf %39, %38 : vector<8x4xf32>
    %41 = vector.extract_strided_slice %37 {offsets = [0, 0], sizes = [8, 4], strides = [1, 1]} : vector<8x8xf32> to vector<8x4xf32>
    %42 = tpu.concatenate %40, %41 in 1 : vector<8x4xf32>, vector<8x4xf32> -> vector<8x8xf32>
    %43 = arith.mulf %37, %7 : vector<8x8xf32>
    %44 = arith.mulf %42, %8 : vector<8x8xf32>
    %45 = arith.addf %43, %44 : vector<8x8xf32>
    %46 = tpu.concatenate %18, %27, %36, %45 in 1 : vector<8x8xf32>, vector<8x8xf32>, vector<8x8xf32>, vector<8x8xf32> -> vector<8x32xf32>
    %c0_14 = arith.constant 0 : index
    %c0_15 = arith.constant 0 : index
    %c0_16 = arith.constant 0 : index
    %47 = vector.load %arg7[%c0_14, %c0_15, %c0_16] : memref<1x8x32xf32, #tpu.memory_space<vmem>>, vector<1x8x32xf32>
    %48 = vector.shape_cast %47 : vector<1x8x32xf32> to vector<8x32xf32>
    %49 = vector.shape_cast %46 : vector<8x32xf32> to vector<1x8x32xf32>
    tpu.vector_store %arg7[%c0_14, %c0_15, %c0_16], %49 {strides = array<i32>} : memref<1x8x32xf32, #tpu.memory_space<vmem>>, vector<1x8x32xf32>,
    %50 = vector.extract_strided_slice %6 {offsets = [0, 32], sizes = [8, 16], strides = [1, 1]} : vector<8x64xf32> to vector<8x16xf32>
    %51 = vector.extract_strided_slice %50 {offsets = [0, 0], sizes = [8, 8], strides = [1, 1]} : vector<8x16xf32> to vector<8x8xf32>
    %52 = vector.extract_strided_slice %51 {offsets = [0, 4], sizes = [8, 4], strides = [1, 1]} : vector<8x8xf32> to vector<8x4xf32>
    %cst_17 = arith.constant 0.000000e+00 : f32
    %53 = vector.broadcast %cst_17 : f32 to vector<8x4xf32>
    %54 = arith.subf %53, %52 : vector<8x4xf32>
    %55 = vector.extract_strided_slice %51 {offsets = [0, 0], sizes = [8, 4], strides = [1, 1]} : vector<8x8xf32> to vector<8x4xf32>
    %56 = tpu.concatenate %54, %55 in 1 : vector<8x4xf32>, vector<8x4xf32> -> vector<8x8xf32>
    %57 = arith.mulf %51, %7 : vector<8x8xf32>
    %58 = arith.mulf %56, %8 : vector<8x8xf32>
    %59 = arith.addf %57, %58 : vector<8x8xf32>
    %60 = vector.extract_strided_slice %50 {offsets = [0, 8], sizes = [8, 8], strides = [1, 1]} : vector<8x16xf32> to vector<8x8xf32>
    %61 = vector.extract_strided_slice %60 {offsets = [0, 4], sizes = [8, 4], strides = [1, 1]} : vector<8x8xf32> to vector<8x4xf32>
    %cst_18 = arith.constant 0.000000e+00 : f32
    %62 = vector.broadcast %cst_18 : f32 to vector<8x4xf32>
    %63 = arith.subf %62, %61 : vector<8x4xf32>
    %64 = vector.extract_strided_slice %60 {offsets = [0, 0], sizes = [8, 4], strides = [1, 1]} : vector<8x8xf32> to vector<8x4xf32>
    %65 = tpu.concatenate %63, %64 in 1 : vector<8x4xf32>, vector<8x4xf32> -> vector<8x8xf32>
    %66 = arith.mulf %60, %7 : vector<8x8xf32>
    %67 = arith.mulf %65, %8 : vector<8x8xf32>
    %68 = arith.addf %66, %67 : vector<8x8xf32>
    %69 = tpu.concatenate %59, %68 in 1 : vector<8x8xf32>, vector<8x8xf32> -> vector<8x16xf32>
    %c0_19 = arith.constant 0 : index
    %c0_20 = arith.constant 0 : index
    %c0_21 = arith.constant 0 : index
    %70 = vector.load %arg8[%c0_19, %c0_20, %c0_21] : memref<1x8x16xf32, #tpu.memory_space<vmem>>, vector<1x8x16xf32>
    %71 = vector.shape_cast %70 : vector<1x8x16xf32> to vector<8x16xf32>
    %72 = vector.shape_cast %69 : vector<8x16xf32> to vector<1x8x16xf32>
    tpu.vector_store %arg8[%c0_19, %c0_20, %c0_21], %72 {strides = array<i32>} : memref<1x8x16xf32, #tpu.memory_space<vmem>>, vector<1x8x16xf32>,
    %73 = vector.extract_strided_slice %6 {offsets = [0, 48], sizes = [8, 16], strides = [1, 1]} : vector<8x64xf32> to vector<8x16xf32>
    %c0_22 = arith.constant 0 : index
    %c0_23 = arith.constant 0 : index
    %c0_24 = arith.constant 0 : index
    %74 = vector.load %arg9[%c0_22, %c0_23, %c0_24] : memref<1x8x16xf32, #tpu.memory_space<vmem>>, vector<1x8x16xf32>
    %75 = vector.shape_cast %74 : vector<1x8x16xf32> to vector<8x16xf32>
    %76 = vector.shape_cast %73 : vector<8x16xf32> to vector<1x8x16xf32>
    tpu.vector_store %arg9[%c0_22, %c0_23, %c0_24], %76 {strides = array<i32>} : memref<1x8x16xf32, #tpu.memory_space<vmem>>, vector<1x8x16xf32>,
    return
  }
  func.func @transform_0(%arg0: i32, %arg1: i32) -> (i32, i32, i32) {
    %c0_i32 = arith.constant 0 : i32
    %c0_i32_0 = arith.constant 0 : i32
    return %arg0, %arg1, %c0_i32 : i32, i32, i32
  }
  func.func @transform_1(%arg0: i32, %arg1: i32) -> (i32, i32) {
    %c0_i32 = arith.constant 0 : i32
    %c0_i32_0 = arith.constant 0 : i32
    %c0_i32_1 = arith.constant 0 : i32
    return %c0_i32, %c0_i32_0 : i32, i32
  }
  func.func @transform_2(%arg0: i32, %arg1: i32) -> (i32, i32) {
    %c0_i32 = arith.constant 0 : i32
    %c0_i32_0 = arith.constant 0 : i32
    %c0_i32_1 = arith.constant 0 : i32
    return %c0_i32, %c0_i32_0 : i32, i32
  }
  func.func @transform_3(%arg0: i32, %arg1: i32) -> (i32, i32) {
    %c0_i32 = arith.constant 0 : i32
    %c0_i32_0 = arith.constant 0 : i32
    return %arg1, %c0_i32 : i32, i32
  }
  func.func @transform_4(%arg0: i32, %arg1: i32) -> (i32, i32) {
    %c0_i32 = arith.constant 0 : i32
    %c0_i32_0 = arith.constant 0 : i32
    return %arg1, %c0_i32 : i32, i32
  }
  func.func @transform_5(%arg0: i32, %arg1: i32) -> (i32, i32, i32) {
    %c0_i32 = arith.constant 0 : i32
    %c0_i32_0 = arith.constant 0 : i32
    return %arg0, %arg1, %c0_i32 : i32, i32, i32
  }
  func.func @transform_6(%arg0: i32, %arg1: i32) -> (i32, i32, i32) {
    %c0_i32 = arith.constant 0 : i32
    %c0_i32_0 = arith.constant 0 : i32
    return %arg0, %arg1, %c0_i32 : i32, i32, i32
  }
  func.func @transform_7(%arg0: i32, %arg1: i32) -> (i32, i32, i32) {
    %c0_i32 = arith.constant 0 : i32
    %c0_i32_0 = arith.constant 0 : i32
    return %arg0, %arg1, %c0_i32 : i32, i32, i32
  }
}

</mosaic_0001>

<bundles_post_ra>
// kernel: tpu_custom_call.1
= control target key start
LH: loop header
LB: loop body
LE: loop exit
PB: predicated region body
PF: predicated region fallthrough
CT: control target
= control target key end

     0   :  { %13 = vsyncpa [#allocation3], 0  ;;  %s1653_s0 = inlined_call_operand.hbm [shape: f32[2,8,32], index: 0, kind: input, shape index: {}]   ;;  %s1654_s1 = inlined_call_operand.hbm [shape: f32[32,64], index: 1, kind: input, shape index: {}]   ;;  %s1655_s2 = inlined_call_operand.vmem [shape: f32[1,64], index: 2, kind: input, shape index: {}]   ;;  %s1656_s3 = inlined_call_operand.vmem [shape: f32[8,8], index: 3, kind: input, shape index: {}]   ;;  %s1657_s4 = inlined_call_operand.hbm [shape: f32[8,8], index: 4, kind: input, shape index: {}]   ;;  %s1658_s5 = inlined_call_operand.hbm [shape: f32[2,8,32], index: 5, kind: output, shape index: {0}]   ;;  %s1659_s6 = inlined_call_operand.hbm [shape: f32[2,8,16], index: 6, kind: output, shape index: {1}]   ;;  %s1660_s7 = inlined_call_operand.hbm [shape: f32[2,8,16], index: 7, kind: output, shape index: {2}]  }
   0x1   :  { %15 = vsyncpa [#allocation3 + $0x1], 0 }
   0x2   :  { %16 = vsyncpa [#allocation6], 0 }
   0x3   :  { %17 = vsyncpa [#allocation4], 0 }
   0x4   :  { %19 = vsyncpa [#allocation4 + $0x1], 0 }
   0x5   :  { %20 = vsyncpa [#allocation10], 0 }
   0x6   :  { %22 = vsyncpa [#allocation10 + $0x1], 0  ;;  %s1284_s24 = smov 0   ;;  %s1286_s25 = smov 0  }
   0x7   :  { %s1288_s26 = smov 0   ;;  %s1290_s27 = smov 0  }
   0x8   :  { %s1292_s28 = smov 0   ;;  %s1294_s29 = smov 0  }
   0x9 LB: > { %s1315_s30 = sadd.s32 4294967295, %s1217_s29   ;;  %s1662_s8 = sadd.s32 4294967294, %s1217_s29   ;;  %s1217_s29 = sphi %s1294_s29, %s28_s29   ;;  %s1213_s28 = sphi %s1292_s28, %s1688_s28   ;;  %s1209_s27 = sphi %s1290_s27, %s1687_s27   ;;  %s1205_s26 = sphi %s1288_s26, %s1686_s26   ;;  %s1201_s25 = sphi %s1286_s25, %s1685_s25   ;;  %s1197_s24 = sphi %s1284_s24, %s1684_s24  }
   0xa   : > { %p62_p0 = scmp.ne.s32.totalorder %s1201_s25, %s1197_s24  ;;  %p1661_p1 = scmp.eq.s32.totalorder %s1315_s30, 0 }
   0xb   : > { %p188_p3 = scmp.eq.s32.totalorder %s1662_s8, 1  ;;  %p827_p5 = scmp.ge.s32.totalorder %s1217_s29, 1 }
   0xc   : > { %p1326_p4 = por %p1661_p1, %p62_p0  ;;  %p251_p7 = scmp.lt.s32.totalorder %s1217_s29, 3 }
   0xd   : > { %p1331_p6 = por %p188_p3, %p62_p0  ;;  %s1219_s12 = smov [#allocation5]  }
   0xe   : > { %s1667_s9 = scalar_select %p1326_p4, 1, 0 }
   0xf   : > { %s1668_s10 = scalar_select %p1331_p6, 1, 0 }
  0x10   : > { %p1336_p8 = pnand %p827_p5, %p251_p7  ;;  %s263_s13 = sshll.u32 %s1219_s12, 4  ;;  %s1340_s13 = int_to_ptr.vmem [resolvable:$true] %s263_s13 }
  0x11   : > { %1669 = sst [smem:[#allocation16_spill]] %s1668_s10  ;;  %s1220_s15 = smov [#allocation7]  }
  0x12   : > { %p889_p9 = pneg %p1336_p8  ;;  %s289_s16 = sshll.u32 %s1220_s15, 4  ;;  %s1351_s16 = int_to_ptr.vmem [resolvable:$true] %s289_s16 }
  0x13   : > { %s985_s19 = scalar_lea.hbm %s1654_s1, 512 }
  0x14   : > { %p1347_p11 = pnand %p889_p9, %p1661_p1  ;;  %p986_p12 = scmp.ne.s32.totalorder %s1654_s1, %s985_s19 }
  0x15   : > { %p992_p5 = scmp.lt.u32.totalorder %s985_s19, %s1654_s1 }
  0x16   : > { %p987_p13 = pneg %p1347_p11 }
  0x18   : > { %p988_p0 = pnand %p987_p13, %p986_p12 }
  0x1a   : > { %p989_p3 = pneg %p988_p0 }
  0x1c   : > { %p994_p7 = pnand %p992_p5, %p989_p3 }
  0x1e   : > { %997 = shalt.err (!%p994_p7)
}
  0x1f   : > { %s998_s12 = scalar_lea.vmem %s1340_s13, 512  ;;  %p1006_p2 = scmp.lt.s32.totalorder %s1340_s13, %s1340_s13 }
  0x20   : > { %p999_p9 = scmp.ne.s32.totalorder %s1340_s13, %s998_s12  ;;  %p1007_p12 = scmp.lt.s32.totalorder %s998_s12, %s998_s12 }
  0x22   : > { %p1001_p10 = pnand %p999_p9, %p987_p13  ;;  %p1008_p0 = por %p1007_p12, %p1006_p2 }
  0x24   : > { %p1002_p1 = pneg %p1001_p10 }
  0x26   : > { %p1009_p6 = pnand %p1008_p0, %p1002_p1 }
  0x28   : > { %1012 = shalt.err (!%p1009_p6)
}
  0x29   : > { %s1221_s15 = smov 128   ;;  %s1222_s17 = smov 8  }
  0x2a   : > { %892 = dma.hbm_to_vmem [thread:$0]  (!%p1347_p11), %s1654_s1, 512, %s1340_s13, [#allocation6], %s1221_s15, %s1221_s15, %s1222_s17  }
  0x2b   : > { %s1013_s22 = scalar_lea.hbm %s1657_s4, 128 }
  0x2c   : > { %p1014_p2 = scmp.ne.s32.totalorder %s1657_s4, %s1013_s22  ;;  %p1020_p10 = scmp.lt.u32.totalorder %s1013_s22, %s1657_s4 }
  0x2e   : > { %p1016_p1 = pnand %p1014_p2, %p987_p13 }
  0x30   : > { %p1017_p6 = pneg %p1016_p1 }
  0x32   : > { %p1022_p3 = pnand %p1020_p10, %p1017_p6 }
  0x34   : > { %1025 = shalt.err (!%p1022_p3)
}
  0x35   : > { %s1026_s13 = scalar_lea.vmem %s1351_s16, 128  ;;  %p1034_p12 = scmp.lt.s32.totalorder %s1351_s16, %s1351_s16 }
  0x36   : > { %p1027_p5 = scmp.ne.s32.totalorder %s1351_s16, %s1026_s13  ;;  %p1035_p0 = scmp.lt.s32.totalorder %s1026_s13, %s1026_s13 }
  0x38   : > { %p1029_p7 = pnand %p1027_p5, %p987_p13  ;;  %p1036_p2 = por %p1035_p0, %p1034_p12 }
  0x3a   : > { %p1030_p9 = pneg %p1029_p7 }
  0x3c   : > { %p1037_p1 = pnand %p1036_p2, %p1030_p9 }
  0x3e   : > { %1040 = shalt.err (!%p1037_p1)
}
  0x3f   : > { %895 = dma.hbm_to_vmem [thread:$0]  (!%p1347_p11), %s1657_s4, 128, %s1351_s16, [#allocation6]  }
  0x40   : > { %s40_s15 = sadd.s32 1, %s1213_s28  ;;  %s49_s17 = sadd.s32 1, %s1205_s26 }
  0x41   : > { %p42_p13 = scmp.ge.s32.totalorder %s40_s15, 2  ;;  %p56_p6 = scmp.ne.s32.totalorder %s1205_s26, %s1201_s25 }
  0x42   : > { %p57_p10 = scmp.eq.s32.totalorder %s1217_s29, 0  ;;  %p912_p3 = scmp.lt.s32.totalorder %s1217_s29, 2 }
  0x43   : > { %s1690_s15 = smov (%p42_p13, %s40_s15), 0  ;;  %p1672_p7 = scmp.eq.s32.totalorder %s1315_s30, 1 }
  0x44   : > { %p58_p5 = por %p57_p10, %p56_p6  ;;  %s44_s18 = ssub.s32 %s1213_s28, %s1690_s15 }
  0x45   : > { %p1415_p9 = por %p1672_p7, %p56_p6  ;;  %s300_s19 = sand.u32 1, %s1205_s26  }
  0x46   : > { %p47_p12 = scmp.eq.s32.totalorder %s44_s18, 0  ;;  %s832_s16 = sshll.u32 %s300_s19, 3 }
  0x47   : > { %s1673_s14 = scalar_select %p1415_p9, 1, 0 }
  0x48   : > { %s833_s20 = sshll.u32 %s1213_s28, 7  ;;  %s304_s13 = scalar_lea.vmem [#allocation2], %s832_s16 }
  0x49   : > { %s1424_s21 = scalar_select %p47_p12, %s1205_s26, %s49_s17  }
  0x4a   : > { %s1429_s12 = scalar_lea.hbm %s1653_s0, %s833_s20  ;;  %s312_s8 = sshll.u32 %s304_s13, 4  ;;  %s1437_s8 = int_to_ptr.vmem [resolvable:$true] %s312_s8 }
  0x4b   : > { %p1433_p11 = pnand %p912_p3, %p58_p5  ;;  %s301_s17 = scalar_lea.sflag [#allocation3], %s300_s19 }
  0x4c   : > { %s1041_s18 = scalar_lea.hbm %s1429_s12, 128  ;;  %s1046_s22 = scalar_lea.hbm %s1653_s0, 256 }
  0x4d   : > { %p1042_p0 = scmp.ne.s32.totalorder %s1429_s12, %s1041_s18  ;;  %p1043_p2 = pneg %p1433_p11 }
  0x4e   : > { %p1047_p6 = scmp.lt.u32.totalorder %s1429_s12, %s1653_s0  ;;  %p1048_p10 = scmp.lt.u32.totalorder %s1046_s22, %s1041_s18 }
  0x4f   : > { %p1044_p1 = pnand %p1043_p2, %p1042_p0  ;;  %p1050_p5 = scmp.lt.u32.totalorder %s1041_s18, %s1429_s12 }
  0x50   : > { %p1049_p3 = por %p1048_p10, %p1047_p6 }
  0x51   : > { %p1045_p13 = pneg %p1044_p1 }
  0x52   : > { %p1051_p7 = por %p1050_p5, %p1049_p3 }
  0x54   : > { %p1052_p12 = pnand %p1051_p7, %p1045_p13 }
  0x56   : > { %1055 = shalt.err (!%p1052_p12)
}
  0x57   : > { %s1056_s19 = scalar_lea.vmem %s1437_s8, 128  ;;  %s1223_s16 = smov [#allocation2]  }
  0x58   : > { %p1057_p0 = scmp.ne.s32.totalorder %s1437_s8, %s1056_s19  ;;  %s1061_s20 = sshll.u32 %s1223_s16, 4  ;;  %s1062_s20 = int_to_ptr.vmem [resolvable:$false] %s1061_s20 }
  0x59   : > { %s1063_s23 = scalar_lea.vmem %s1062_s20, 256  ;;  %p1064_p4 = scmp.lt.s32.totalorder %s1437_s8, %s1062_s20 }
  0x5a   : > { %p1059_p1 = pnand %p1057_p0, %p1043_p2  ;;  %p1065_p6 = scmp.lt.s32.totalorder %s1063_s23, %s1056_s19 }
  0x5c   : > { %p1060_p9 = pneg %p1059_p1  ;;  %p1066_p10 = por %p1065_p6, %p1064_p4 }
  0x5e   : > { %p1067_p3 = pnand %p1066_p10, %p1060_p9 }
  0x60   : > { %1070 = shalt.err (!%p1067_p3)
}
  0x61   : > { %899 = dma.hbm_to_vmem [thread:$0]  (!%p1433_p11), %s1429_s12, 128, %s1437_s8, %s301_s17  }
  0x62   : > { %321 = sbr.rel (%p1336_p8) target bundleno = 727 (0x2d7), region = 40  ;;  %s1467_s18 = sand.u32 (!%p1336_p8), 1, %s1201_s25  }
  0x63   : > { %s1470_s22 = sshll.u32 (!%p1336_p8), %s1467_s18, 3  ;;  %s324_s13 = scalar_lea.sflag (!%p1336_p8), [#allocation3], %s1467_s18 }
  0x64   : > { %s327_s19 = scalar_lea.vmem (!%p1336_p8), [#allocation2], %s1470_s22  ;;  %p1675_p4 = scmp.ne.s32.totalorder (!%p1336_p8), %s1667_s9, 0 }
  0x69   : > { %1180 = dma.done.wait (%p1675_p4), %s324_s13, 128  }
  0x6a   : > { %1182 = vsyncadd (%p1675_p4), %s324_s13, 4294967168  ;;  %p1676_p9 = scmp.eq.s32.totalorder %s1315_s30, 0 }
  0x6c   : > { %1184 = dma.done.wait (%p1676_p9), [#allocation6], 640   ;;  %p1677_p8 = pmov %p1676_p9 }
  0x6d   : > { %v1224_v0 = vmov 0.0|0.0   ;;  %vm1225_vm0 = vmmov 0   ;;  %v1226_v1 = vmov 0.0   ;;  %v385_v2 = vld [vmem:[#allocation5] sm:$0xff]  ;;  %v386_v3 = vld [vmem:[#allocation5 + $0x8] sm:$0xff]  ;;  %v387_v4 = vld [vmem:[#allocation5 + $0x10] sm:$0xff] }
  0x6e   : > { %1186 = vsyncadd (%p1677_p8), [#allocation6], 4294966656  ;;  %867 = vmatprep.subr.bf16.mxu0 %v1224_v0  ;;  %864 = vmatprep.mubr.msk.f32.mxu0 %vm1225_vm0, %v1226_v1  ;;  %v868_v5 = vpack.c.bf16 %v386_v3, %v385_v2  ;;  %v388_v6 = vld [vmem:[#allocation5 + $0x18] sm:$0xff]  ;;  %vm396_vm1 = vcmask 261120   ;;  %v841_v9 = vld [vmem:[%s1655_s2] ss:$0 sm:$0xff] }
  0x6f   : > { %v871_v7 = vpack.c.bf16 %v388_v6, %v387_v4  ;;  %v384_v8 = vld [vmem:[%s327_s19] sm:$0xff]  ;;  %s1227_s12 = smov 84   ;;  %s1228_s8 = smov 92   ;;  %vm481_vm2 = vcmask 31744   ;;  %v471_v17 = vld [vmem:[#allocation7] sm:$0xff]  ;;  %vm538_vm3 = vcmask 64512  }
  0x70   : > { %869 = vmatpush3.bf16.msra.mxu0 %v868_v5  ;;  %s1229_s10 = smov 100   ;;  %v1494_v14 = vld [vmem:[%s1656_s3] sm:$0xff]  ;;  %s1230_s20 = smov 124   ;;  %vm540_vm4 = vcmask 130048   ;;  %vm542_vm5 = vcmask 195584  }
  0x71   : > { %870 = vmatprep.subr.bf16.mxu0 %v1224_v0  ;;  %s1231_s23 = smov 32   ;;  %s1232_s13 = smov 116  }
  0x72   : > { %s1233_s19 = smov 108   ;;  %s1234_s9 = smov 40  }
  0x73   : > { %s1235_s11 = smov 4   ;;  %s1239_s17 = smov 96  }
  0x74   : > { %872 = vmatpush3.bf16.msra.mxu0 %v871_v7  ;;  %s1240_s16 = smov 80   ;;  %p1678_p2 = scmp.ne.s32.totalorder %s1673_s14, 0 }
  0x77   : > { %865 = vmatmul.mubr.msk.f32.vlgmr.msra.gmra.mrb[0].mxu0 %vm396_vm1, %v384_v8 }
 0x14a   : > { %v466_v10 = vpop.f32.mrb[0].mxu0 }
 0x14b   : > { %v1486_v11 = vadd.f32 %v841_v9, %v466_v10  ;;  %v866_v12 = vpop.f32.mrb[1].mxu0 }
 0x14d   : > { %v472_v13 = vsub.f32 0.0, %v1486_v11  ;;  %v483_v53 = vmul.f32 %v1494_v14, %v1486_v11 }
 0x14f   : > { %562 = vrot.lane.b32.xlu1 %v472_v13, %s1227_s12  ;;  %545 = vrot.lane.b32.xlu0 %v472_v13, %s1228_s8  ;;  %s1236_s12 = smov 16  }
 0x153   : > { %565 = vrot.lane.b32.xlu1 %v1486_v11, %s1228_s8  ;;  %548 = vrot.lane.b32.xlu0 %v1486_v11, %s1229_s10  ;;  %s1237_s8 = smov 8  }
 0x157   : > { %489 = vrot.lane.b32.xlu1 %v1486_v11, %s1230_s20  ;;  %552 = vrot.lane.b32.xlu0 %v1494_v14, %s1231_s23 }
 0x15b   : > { %507 = vrot.lane.b32.xlu1 %v1486_v11, %s1232_s13  ;;  %486 = vrot.lane.b32.xlu0 %v472_v13, %s1232_s13 }
 0x15f   : > { %524 = vrot.lane.b32.xlu1 %v1486_v11, %s1233_s19  ;;  %504 = vrot.lane.b32.xlu0 %v472_v13, %s1233_s19 }
 0x163   : > { %569 = vrot.lane.b32.xlu1 %v1494_v14, %s1234_s9  ;;  %521 = vrot.lane.b32.xlu0 %v472_v13, %s1229_s10  ;;  %s1238_s10 = smov 24  }
 0x1c1   : > { %v563_v15 = vpop.permute.xlu1 %562  ;;  %v546_v16 = vpop.permute.xlu0 %545 }
 0x1c5   : > { %v566_v18 = vpop.permute.xlu1 %565  ;;  %v549_v19 = vpop.permute.xlu0 %548 }
 0x1c6   : > { %v568_v20 = vsel %vm481_vm2, %v563_v15, %v566_v18  ;;  %v551_v21 = vsel %vm481_vm2, %v546_v16, %v549_v19 }
 0x1c7   : > { %v573_v22 = vmul.f32 %v568_v20, %v471_v17  ;;  %v556_v23 = vmul.f32 %v551_v21, %v471_v17 }
 0x1c9   : > { %575 = vrot.lane.b32.xlu1 %v573_v22, %s1234_s9  ;;  %v490_v24 = vpop.permute.xlu1 %489  ;;  %558 = vrot.lane.b32.xlu0 %v556_v23, %s1231_s23  ;;  %v553_v25 = vpop.permute.xlu0 %552  ;;  %s365_s23 = scalar_lea.vmem [#allocation8], %s1470_s22 }
 0x1ca   : > { %v555_v38 = vmul.f32 %v553_v25, %v1486_v11  ;;  %s618_s13 = sshll.u32 %s365_s23, 4  ;;  %s1531_s13 = int_to_ptr.vmem [resolvable:$true] %s618_s13 }
 0x1cd   : > { %478 = vrot.lane.b32.xlu1 %v1486_v11, %s1235_s11  ;;  %474 = vrot.lane.b32.xlu0 %v472_v13, %s1230_s20  ;;  %v487_v26 = vpop.permute.xlu0 %486  ;;  %v508_v27 = vpop.permute.xlu1 %507  ;;  %s1520_s20 = sshll.u32 %s1209_s27, 7  ;;  %s594_s27 = scalar_lea.sflag [#allocation4], %s1467_s18 }
 0x1ce   : > { %v492_v28 = vsel %vm481_vm2, %v487_v26, %v490_v24  ;;  %s1529_s11 = scalar_lea.hbm %s1658_s5, %s1520_s20 }
 0x1cf   : > { %v498_v30 = vmul.f32 %v492_v28, %v471_v17 }
 0x1d1   : > { %511 = vrot.lane.b32.xlu1 %v1494_v14, %s1236_s12  ;;  %494 = vrot.lane.b32.xlu0 %v1494_v14, %s1237_s8  ;;  %v505_v29 = vpop.permute.xlu0 %504  ;;  %v525_v32 = vpop.permute.xlu1 %524 }
 0x1d2   : > { %v510_v31 = vsel %vm481_vm2, %v505_v29, %v508_v27 }
 0x1d3   : > { %v515_v35 = vmul.f32 %v510_v31, %v471_v17 }
 0x1d5   : > { %528 = vrot.lane.b32.xlu1 %v1494_v14, %s1238_s10  ;;  %500 = vrot.lane.b32.xlu0 %v498_v30, %s1237_s8  ;;  %v522_v33 = vpop.permute.xlu0 %521  ;;  %v570_v37 = vpop.permute.xlu1 %569  ;;  %s1241_s8 = smov [#allocation8]  }
 0x1d6   : > { %v527_v34 = vsel %vm481_vm2, %v522_v33, %v525_v32  ;;  %v572_v39 = vmul.f32 %v570_v37, %v1486_v11 }
 0x1d7   : > { %v532_v36 = vmul.f32 %v527_v34, %v471_v17 }
 0x1d9   : > { %517 = vrot.lane.b32.xlu0 %v515_v35, %s1236_s12  ;;  %534 = vrot.lane.b32.xlu1 %v532_v36, %s1238_s10  ;;  %s1071_s12 = scalar_lea.vmem %s1531_s13, 128  ;;  %s1075_s10 = sshll.u32 %s1241_s8, 4  ;;  %s1076_s10 = int_to_ptr.vmem [resolvable:$false] %s1075_s10 }
 0x1da   : > { %p1072_p11 = scmp.ne.s32.totalorder %s1531_s13, %s1071_s12  ;;  %p1078_p7 = scmp.lt.s32.totalorder %s1531_s13, %s1076_s10 }
 0x1dc   : > { %p1073_p13 = pnand %p1072_p11, %p1678_p2 }
 0x1de   : > { %p1074_p5 = pneg %p1073_p13 }
 0x23b   : > { %v576_v40 = vpop.permute.xlu1 %575  ;;  %v559_v41 = vpop.permute.xlu0 %558 }
 0x23c   : > { %v578_v42 = vadd.f32 %v576_v40, %v572_v39  ;;  %v561_v43 = vadd.f32 %v559_v41, %v555_v38 }
 0x23e   : > { %584 = vrot.lane.b32.xlu1 %v578_v42, %s1239_s17  ;;  %580 = vrot.lane.b32.xlu0 %v561_v43, %s1239_s17  ;;  %s1077_s17 = scalar_lea.vmem %s1076_s10, 256 }
 0x23f   : > { %v479_v44 = vpop.permute.xlu1 %478  ;;  %v475_v45 = vpop.permute.xlu0 %474  ;;  %p1079_p12 = scmp.lt.s32.totalorder %s1077_s17, %s1071_s12 }
 0x240   : > { %v482_v48 = vsel %vm481_vm2, %v475_v45, %v479_v44 }
 0x241   : > { %v484_v49 = vmul.f32 %v482_v48, %v471_v17  ;;  %p1080_p0 = por %p1079_p12, %p1078_p7 }
 0x242   : > { %589 = vrot.lane.b32.xlu0 %v1486_v11, %s1240_s16 }
 0x243   : > { %v512_v46 = vpop.permute.xlu1 %511  ;;  %v495_v47 = vpop.permute.xlu0 %494  ;;  %v485_v57 = vadd.f32 %v484_v49, %v483_v53  ;;  %p1081_p1 = pnand %p1080_p0, %p1074_p5 }
 0x244   : > { %v497_v50 = vmul.f32 %v495_v47, %v1486_v11  ;;  %v514_v55 = vmul.f32 %v512_v46, %v1486_v11 }
 0x247   : > { %v529_v51 = vpop.permute.xlu1 %528  ;;  %v501_v52 = vpop.permute.xlu0 %500 }
 0x248   : > { %v503_v54 = vadd.f32 %v501_v52, %v497_v50  ;;  %v531_v56 = vmul.f32 %v529_v51, %v1486_v11 }
 0x24a   : > { %v539_v62 = vsel %vm538_vm3, %v485_v57, %v503_v54 }
 0x24b   : > { %v535_v58 = vpop.permute.xlu1 %534  ;;  %v518_v59 = vpop.permute.xlu0 %517 }
 0x24c   : > { %v537_v60 = vadd.f32 %v535_v58, %v531_v56  ;;  %v520_v61 = vadd.f32 %v518_v59, %v514_v55 }
 0x24e   : > { %v541_v63 = vsel %vm540_vm4, %v539_v62, %v520_v61 }
 0x24f   : > { %v543_v0 = vsel %vm542_vm5, %v541_v63, %v537_v60 }
 0x250   : > { %544 = vst.msk [vmem:[%s365_s23] sm:$0xff] %vm396_vm1, %v543_v0 }
 0x251   : > { %1084 = shalt.err (!%p1081_p1)
}
 0x252   : > { %s1085_s18 = scalar_lea.hbm %s1529_s11, 128  ;;  %s1089_s19 = scalar_lea.hbm %s1658_s5, 256 }
 0x253   : > { %p1086_p6 = scmp.ne.s32.totalorder %s1529_s11, %s1085_s18  ;;  %p1090_p4 = scmp.lt.u32.totalorder %s1529_s11, %s1658_s5 }
 0x254   : > { %p1091_p9 = scmp.lt.u32.totalorder %s1089_s19, %s1085_s18  ;;  %p1093_p11 = scmp.lt.u32.totalorder %s1085_s18, %s1529_s11 }
 0x255   : > { %p1087_p10 = pnand %p1086_p6, %p1678_p2 }
 0x256   : > { %p1092_p8 = por %p1091_p9, %p1090_p4 }
 0x257   : > { %p1088_p3 = pneg %p1087_p10 }
 0x258   : > { %p1094_p13 = por %p1093_p11, %p1092_p8 }
 0x25a   : > { %p1095_p5 = pnand %p1094_p13, %p1088_p3 }
 0x25c   : > { %1098 = shalt.err (!%p1095_p5)
}
 0x25d   : > { %883 = dma.vmem_to_hbm [thread:$0]  (%p1678_p2), %s1531_s13, 128, %s1529_s11, %s594_s27  }
 0x25e   : > { %s598_s12 = sand.u32 1, %s1315_s30   ;;  %s372_s10 = scalar_lea.vmem [#allocation9], %s1470_s22 }
 0x25f   : > { %s632_s17 = sshll.u32 %s372_s10, 4  ;;  %s1666_s16 = scalar_lea.vmem [#allocation11], %s1470_s22  ;;  %s1567_s17 = int_to_ptr.vmem [resolvable:$true] %s632_s17 }
 0x260   : > { %s646_s18 = sshll.u32 %s1666_s16, 4  ;;  %s1565_s9 = scalar_lea.hbm %s1659_s6, %s1520_s20  ;;  %s1577_s18 = int_to_ptr.vmem [resolvable:$true] %s646_s18 }
 0x261   : > { %s1575_s11 = scalar_lea.hbm %s1660_s7, %s1520_s20  ;;  %s1579_s27 = scalar_lea.sflag [#allocation10], %s598_s12 }
 0x262   : > { %s1099_s8 = scalar_lea.vmem %s1567_s17, 128  ;;  %s1242_s23 = smov [#allocation9]  }
 0x263   : > { %p1100_p7 = scmp.ne.s32.totalorder %s1567_s17, %s1099_s8  ;;  %s1103_s19 = sshll.u32 %s1242_s23, 4  ;;  %s1104_s19 = int_to_ptr.vmem [resolvable:$false] %s1103_s19 }
 0x264   : > { %s1105_s16 = scalar_lea.vmem %s1104_s19, 256  ;;  %p1106_p1 = scmp.lt.s32.totalorder %s1567_s17, %s1104_s19 }
 0x265   : > { %p1101_p12 = pnand %p1100_p7, %p1678_p2  ;;  %p1107_p6 = scmp.lt.s32.totalorder %s1105_s16, %s1099_s8 }
 0x267   : > { %p1102_p0 = pneg %p1101_p12  ;;  %p1108_p10 = por %p1107_p6, %p1106_p1 }
 0x269   : > { %p1109_p3 = pnand %p1108_p10, %p1102_p0 }
 0x2b0   : > { %v585_v1 = vpop.permute.xlu1 %584  ;;  %v581_v2 = vpop.permute.xlu0 %580 }
 0x2b1   : > { %v587_v3 = vsel %vm538_vm3, %v581_v2, %v585_v1 }
 0x2b2   : > { %588 = vst.msk [vmem:[%s372_s10] sm:$0xff] %vm540_vm4, %v587_v3 }
 0x2b3   : > { %1112 = shalt.err (!%p1109_p3)
}
 0x2b4   : > { %s1113_s20 = scalar_lea.hbm %s1565_s9, 128  ;;  %s1117_s30 = scalar_lea.hbm %s1659_s6, 256 }
 0x2b5   : > { %p1114_p4 = scmp.ne.s32.totalorder %s1565_s9, %s1113_s20  ;;  %p1118_p11 = scmp.lt.u32.totalorder %s1565_s9, %s1659_s6 }
 0x2b6   : > { %p1119_p13 = scmp.lt.u32.totalorder %s1117_s30, %s1113_s20  ;;  %p1121_p7 = scmp.lt.u32.totalorder %s1113_s20, %s1565_s9 }
 0x2b7   : > { %p1115_p9 = pnand %p1114_p4, %p1678_p2 }
 0x2b8   : > { %p1120_p5 = por %p1119_p13, %p1118_p11 }
 0x2b9   : > { %p1116_p8 = pneg %p1115_p9 }
 0x2ba   : > { %p1122_p12 = por %p1121_p7, %p1120_p5 }
 0x2bc   : > { %p1123_p0 = pnand %p1122_p12, %p1116_p8 }
 0x2be   : > { %1126 = shalt.err (!%p1123_p0)
}
 0x2bf   : > { %884 = dma.vmem_to_hbm [thread:$0]  (%p1678_p2), %s1567_s17, 128, %s1565_s9, %s1579_s27   ;;  %v590_v4 = vpop.permute.xlu0 %589 }
 0x2c0   : > { %s1679_s16 = scalar_lea.vmem [#allocation11], %s1470_s22  ;;  %s1127_s8 = scalar_lea.vmem %s1577_s18, 128 }
 0x2c1   : > { %592 = vst.msk [vmem:[%s1679_s16] sm:$0xff] %vm540_vm4, %v590_v4  ;;  %p1128_p1 = scmp.ne.s32.totalorder %s1577_s18, %s1127_s8  ;;  %s1243_s19 = smov [#allocation11]  }
 0x2c2   : > { %s1131_s20 = sshll.u32 %s1243_s19, 4  ;;  %s1132_s20 = int_to_ptr.vmem [resolvable:$false] %s1131_s20 }
 0x2c3   : > { %p1129_p6 = pnand %p1128_p1, %p1678_p2  ;;  %s1133_s12 = scalar_lea.vmem %s1132_s20, 256 }
 0x2c4   : > { %p1134_p3 = scmp.lt.s32.totalorder %s1577_s18, %s1132_s20  ;;  %p1135_p4 = scmp.lt.s32.totalorder %s1133_s12, %s1127_s8 }
 0x2c5   : > { %p1130_p10 = pneg %p1129_p6 }
 0x2c6   : > { %p1136_p9 = por %p1135_p4, %p1134_p3 }
 0x2c8   : > { %p1137_p8 = pnand %p1136_p9, %p1130_p10 }
 0x2ca   : > { %1140 = shalt.err (!%p1137_p8)
}
 0x2cb   : > { %s1141_s22 = scalar_lea.hbm %s1575_s11, 128  ;;  %s1145_s10 = scalar_lea.hbm %s1660_s7, 256 }
 0x2cc   : > { %p1142_p11 = scmp.ne.s32.totalorder %s1575_s11, %s1141_s22  ;;  %p1146_p7 = scmp.lt.u32.totalorder %s1575_s11, %s1660_s7 }
 0x2cd   : > { %p1147_p12 = scmp.lt.u32.totalorder %s1145_s10, %s1141_s22  ;;  %p1149_p1 = scmp.lt.u32.totalorder %s1141_s22, %s1575_s11 }
 0x2ce   : > { %p1143_p13 = pnand %p1142_p11, %p1678_p2 }
 0x2cf   : > { %p1148_p0 = por %p1147_p12, %p1146_p7 }
 0x2d0   : > { %p1144_p5 = pneg %p1143_p13 }
 0x2d1   : > { %p1150_p6 = por %p1149_p1, %p1148_p0 }
 0x2d3   : > { %p1151_p10 = pnand %p1150_p6, %p1144_p5 }
 0x2d5   : > { %1154 = shalt.err (!%p1151_p10)
}
 0x2d6   : > { %885 = dma.vmem_to_hbm [thread:$0]  (%p1678_p2), %s1577_s18, 128, %s1575_s11, %s1579_s27  }
 0x2d7 PF: > { %s1680_s23 = sld [smem:[#allocation16_spill]]  ;;  %s658_s16 = sand.u32 1, %s1197_s24  }
 0x2d8   : > { %p1682_p4 = scmp.ge.s32.totalorder %s1217_s29, 2  ;;  %s659_s8 = scalar_lea.sflag [#allocation4], %s658_s16 }
 0x2dd   : > { %p1681_p3 = scmp.ne.s32.totalorder %s1680_s23, 0 }
 0x2df   : > { %p901_p9 = pnand %p1682_p4, %p1681_p3 }
 0x2e1   : > { %1188 = dma.done.wait (!%p901_p9), %s659_s8, 128  }
 0x2e2   : > { %1190 = vsyncadd (!%p901_p9), %s659_s8, 4294967168  ;;  %s1683_s19 = sadd.s32 4294967294, %s1217_s29  }
 0x2e3   : > { %s667_s20 = sand.u32 1, %s1683_s19  }
 0x2e4   : > { %s668_s12 = scalar_lea.sflag [#allocation10], %s667_s20 }
 0x2e5   : > { %1192 = dma.done.wait (!%p901_p9), %s668_s12, 256  }
 0x2e6   : > { %1194 = vsyncadd (!%p901_p9), %s668_s12, 4294967040  ;;  %s28_s29 = sadd.s32 1, %s1217_s29   ;;  %s1684_s24 = smov %s1201_s25 }
 0x2e7   : > { %p25_p2 = scmp.ge.s32.totalorder %s28_s29, 4   ;;  %s1685_s25 = smov %s1205_s26 }
 0x2e8   : > { %s1686_s26 = smov %s1424_s21  ;;  %s1687_s27 = smov %s1213_s28 }
 0x2e9   : > { %s1688_s28 = smov %s1690_s15  ;;  %27 = sbr.rel (!%p25_p2) target bundleno = 9 (0x9), region = 129 }
 0x2f0   :  { %682 = vsyncpa [#allocation3], 1 }
 0x2f1   :  { %684 = vsyncpa [#allocation3 + $0x1], 1 }
 0x2f2   :  { %685 = vsyncpa [#allocation6], 1 }
 0x2f3   :  { %686 = vsyncpa [#allocation4], 1 }
 0x2f4   :  { %688 = vsyncpa [#allocation4 + $0x1], 1 }
 0x2f5   :  { %689 = vsyncpa [#allocation10], 1 }
 0x2f6   :  { %691 = vsyncpa [#allocation10 + $0x1], 1 }

</bundles_post_ra>
